<compile_context>
chip_gen: v6e
topology: v6e:2x2x1
jax: 0.10.0
libtpu: 0.0.40
codegen_flags: <defaults>
</compile_context>

<pallas_src>
import functools

import jax
import jax.numpy as jnp
from jax.experimental import pallas as pl
from jax.experimental.pallas import tpu as pltpu


# ----------------------------------------------------------------------------- kernel
def _attn_kernel(x_ref, w1t_ref, b1_ref, w2t_ref, b2_ref, o_ref, *, inv_len):
    """One grid step processes a (B, C, Lp) slab of batch elements.

    x_ref : (B, C, Lp)  input slab (Lp = L padded up to a multiple of 128)
    w1t   : (C, H)      first 1x1-conv weight, pre-transposed
    b1    : (1, H)
    w2t   : (H, C)      second 1x1-conv weight, pre-transposed
    b2    : (1, C)
    o_ref : (B, C, Lp)  output slab
    """
    x = x_ref[...]                                              # native dtype slab
    # Exact f32 lane reduce; padding lanes are zero so the sum is the true-L sum,
    # and inv_len = 1/L gives the true mean.  No full f32 slab copy is kept live
    # for the final multiply.
    s = jnp.sum(x.astype(jnp.float32), axis=-1)                 # (B, C)
    m = s * inv_len                                             # (B, C) channel means

    # Batched squeeze-excite MLP: one tiny matmul pair per slab (MXU cost is hidden
    # under the slab DMA; do not tile these).
    h = jnp.dot(m, w1t_ref[...], preferred_element_type=jnp.float32) + b1_ref[...]
    h = jnp.maximum(h, 0.0)                                     # (B, H)  ReLU
    a = jnp.dot(h, w2t_ref[...], preferred_element_type=jnp.float32) + b2_ref[...]
    a = jax.nn.sigmoid(a)                                       # (B, C)  Sigmoid

    # Broadcast multiply in the input's native dtype (bf16 VALUs on v6e/v7x).
    o_ref[...] = x * a.astype(x.dtype)[:, :, None]


# ----------------------------------------------------------------------------- helpers
def _vmem_capacity_bytes():
    """Physical VMEM of the current generation; conservative fallback if unqueryable."""
    try:
        return int(pltpu.get_tpu_info().vmem_capacity_bytes)
    except Exception:
        return 64 * 1024 * 1024  # v7x per-TensorCore capacity (smallest of v5e/v6e/v7x)


def _pick_batch_block(n, bytes_per_batch_elem, budget_bytes):
    """Largest divisor of n that fits the per-buffer budget while keeping enough grid
    steps for pipelining (>=4 preferred) and an even step count (both v7x TCs)."""
    divisors = [d for d in range(1, n + 1) if n % d == 0]
    fitting = [d for d in divisors if d * bytes_per_batch_elem <= budget_bytes] or [1]

    def largest(pred):
        cands = [d for d in fitting if pred(n // d)]
        return max(cands) if cands else None

    for pred in (
        lambda steps: steps >= 4 and steps % 2 == 0,  # pipelined + even split across TCs
        lambda steps: steps >= 4,                     # pipelined
        lambda steps: steps >= 2 and steps % 2 == 0,  # minimal overlap, even split
        lambda steps: steps >= 2,                     # minimal overlap
        lambda steps: True,                           # whatever fits
    ):
        b = largest(pred)
        if b is not None:
            return b
    return 1


# ----------------------------------------------------------------------------- wrapper
def attention_layer(x, w1, b1, w2, b2):
    """x: (N, C, L); w1: (H, C); b1: (H,); w2: (C, H); b2: (C,) with H = C // 8."""
    N, C, L = x.shape
    H = w1.shape[0]

    # Lane-dense length axis: pad L up to a multiple of 128 so every vreg row and every
    # output store is full-width (unmasked vst).  Zero padding does not change the sum,
    # and the kernel divides by the true L.
    Lp = L if L % 128 == 0 else ((L + 127) // 128) * 128
    padded = Lp != L
    x_in = jnp.pad(x, ((0, 0), (0, 0), (0, Lp - L))) if padded else x

    itemsize = jnp.dtype(x.dtype).itemsize
    per_batch_bytes = C * Lp * itemsize

    capacity = _vmem_capacity_bytes()
    # ~16 MiB slabs on 128-MiB parts (v5e/v6e), ~6.4 MiB on 64-MiB parts (v7x).
    # With double-buffered in + out slabs that is <= ~1/2 (resp. ~2/5) of capacity,
    # leaving headroom for weights, f32 intermediates and compiler scratch.
    budget = capacity // 8 if capacity >= 96 * 1024 * 1024 else capacity // 10
    B = _pick_batch_block(N, per_batch_bytes, budget)
    vmem_limit = int(0.75 * capacity)

    w1_t = jnp.transpose(w1)          # (C, H)
    w2_t = jnp.transpose(w2)          # (H, C)
    b1_2d = b1.reshape(1, H)
    b2_2d = b2.reshape(1, C)

    kernel = functools.partial(_attn_kernel, inv_len=1.0 / L)

    out = pl.pallas_call(
        kernel,
        out_shape=jax.ShapeDtypeStruct((N, C, Lp), x.dtype),
        grid_spec=pltpu.PrefetchScalarGridSpec(
            num_scalar_prefetch=0,
            grid=(N // B,),
            in_specs=[
                pl.BlockSpec((B, C, Lp), lambda n: (n, 0, 0)),
                pl.BlockSpec((C, H), lambda n: (0, 0)),
                pl.BlockSpec((1, H), lambda n: (0, 0)),
                pl.BlockSpec((H, C), lambda n: (0, 0)),
                pl.BlockSpec((1, C), lambda n: (0, 0)),
            ],
            out_specs=pl.BlockSpec((B, C, Lp), lambda n: (n, 0, 0)),
        ),
        compiler_params=pltpu.CompilerParams(
            dimension_semantics=("parallel",),
            vmem_limit_bytes=vmem_limit,
        ),
        # Alias x into the output only when x is the fresh padded temporary we created:
        # that is always safe, whereas aliasing the caller's own buffer could invalidate
        # an array the caller still needs.
        input_output_aliases=({0: 0} if padded else {}),
    )(x_in, w1_t, b1_2d, w2_t, b2_2d)

    return out[:, :, :L] if padded else out


# ---------------------------------------------------------------- spectral-norm glue
def _l2_normalize(v, eps=1e-12):
    return v / (jnp.linalg.norm(v) + eps)


def _spectral_normalize(w, key):
    """One power iteration on the (out, in) matrix, like nn.utils.spectral_norm."""
    out_dim, _ = w.shape
    u = _l2_normalize(jax.random.normal(key, (out_dim,), dtype=w.dtype))
    v = _l2_normalize(w.T @ u)
    u = _l2_normalize(w @ v)
    sigma = u @ (w @ v)
    return w / sigma


# ---------------------------------------------------------------------------- reference
def reference(x, w1, b1, w2, b2):
    m = jnp.mean(x, axis=-1)                               # (N, C)
    h = jnp.maximum(m @ w1.T + b1[None, :], 0.0)           # (N, H)
    a = jax.nn.sigmoid(h @ w2.T + b2[None, :])             # (N, C)
    return x * a[:, :, None]


if __name__ == "__main__":
    # Small shapes consistent with the module (channel must be divisible by 8).
    N, C, L = 2, 32, 16
    H = C // 8

    key = jax.random.PRNGKey(0)
    kx, kw1, kb1, kw2, kb2, ku1, ku2 = jax.random.split(key, 7)

    x = jax.random.normal(kx, (N, C, L), dtype=jnp.float32)

    # Conv1d(k=1) weights: (out, in, 1) -> collapse to (out, in); PyTorch-ish init scale.
    w1 = jax.random.normal(kw1, (H, C), dtype=jnp.float32) * (1.0 / jnp.sqrt(C))
    b1 = jax.random.normal(kb1, (H,), dtype=jnp.float32) * 0.1
    w2 = jax.random.normal(kw2, (C, H), dtype=jnp.float32) * (1.0 / jnp.sqrt(H))
    b2 = jax.random.normal(kb2, (C,), dtype=jnp.float32) * 0.1

    # spectral_norm applied at construction time (module.training == True).
    w1 = _spectral_normalize(w1, ku1)
    w2 = _spectral_normalize(w2, ku2)

    out = jax.jit(attention_layer)(x, w1, b1, w2, b2)
    out = jax.block_until_ready(out)

    ref = reference(x, w1, b1, w2, b2)
    assert out.shape == (N, C, L)
    assert jnp.allclose(out, ref, atol=1e-5, rtol=1e-5), "mismatch vs reference"

    print("KERNEL_OK")
</pallas_src>

<mosaic_0001>
module attributes {stable_mosaic.version = 11 : i64} {
  func.func @_attn_kernel(%arg0: i32, %arg1: memref<1x32x128xf32, #tpu.memory_space<vmem>>, %arg2: memref<32x4xf32, #tpu.memory_space<vmem>>, %arg3: memref<1x4xf32, #tpu.memory_space<vmem>>, %arg4: memref<4x32xf32, #tpu.memory_space<vmem>>, %arg5: memref<1x32xf32, #tpu.memory_space<vmem>>, %arg6: memref<1x32x128xf32, #tpu.memory_space<vmem>>) attributes {dimension_semantics = [#tpu.dimension_semantics<parallel>], iteration_bounds = array<i64: 2>, scalar_prefetch = 0 : i64, scratch_operands = 0 : i64, tpu.core_type = #tpu.core_type<tc>, window_params = [{transform_indices = @transform_0, window_bounds = array<i64: 1, 32, 128>}, {pipeline_mode = #tpu.pipeline_mode<synchronous>, transform_indices = @transform_1, window_bounds = array<i64: 32, 4>}, {pipeline_mode = #tpu.pipeline_mode<synchronous>, transform_indices = @transform_2, window_bounds = array<i64: 1, 4>}, {pipeline_mode = #tpu.pipeline_mode<synchronous>, transform_indices = @transform_3, window_bounds = array<i64: 4, 32>}, {pipeline_mode = #tpu.pipeline_mode<synchronous>, transform_indices = @transform_4, window_bounds = array<i64: 1, 32>}, {transform_indices = @transform_5, window_bounds = array<i64: 1, 32, 128>}]} {
    %c0 = arith.constant 0 : index
    %c0_0 = arith.constant 0 : index
    %c0_1 = arith.constant 0 : index
    %0 = vector.load %arg1[%c0, %c0_0, %c0_1] : memref<1x32x128xf32, #tpu.memory_space<vmem>>, vector<1x32x128xf32>
    %cst = arith.constant dense<0.000000e+00> : vector<1x32xf32>
    %1 = vector.multi_reduction <add>, %0, %cst [2] : vector<1x32x128xf32> to vector<1x32xf32>
    %cst_2 = arith.constant 6.250000e-02 : f32
    %2 = vector.broadcast %cst_2 : f32 to vector<1x32xf32>
    %3 = arith.mulf %1, %2 : vector<1x32xf32>
    %c0_3 = arith.constant 0 : index
    %c0_4 = arith.constant 0 : index
    %4 = vector.load %arg2[%c0_3, %c0_4] : memref<32x4xf32, #tpu.memory_space<vmem>>, vector<32x4xf32>
    %cst_5 = arith.constant dense<0.000000e+00> : vector<1x4xf32>
    %5 = tpu.matmul %3, %4, %cst_5 {dimension_numbers = #tpu.dot_dimension_numbers<[1], [0], [0], [1], [0, 0, 1, 1], [], []>} : vector<1x32xf32>, vector<32x4xf32>, vector<1x4xf32> -> vector<1x4xf32>
    %c0_6 = arith.constant 0 : index
    %c0_7 = arith.constant 0 : index
    %6 = vector.load %arg3[%c0_6, %c0_7] : memref<1x4xf32, #tpu.memory_space<vmem>>, vector<1x4xf32>
    %7 = arith.addf %5, %6 : vector<1x4xf32>
    %cst_8 = arith.constant 0.000000e+00 : f32
    %8 = vector.broadcast %cst_8 : f32 to vector<1x4xf32>
    %9 = arith.maximumf %7, %8 : vector<1x4xf32>
    %c0_9 = arith.constant 0 : index
    %c0_10 = arith.constant 0 : index
    %10 = vector.load %arg4[%c0_9, %c0_10] : memref<4x32xf32, #tpu.memory_space<vmem>>, vector<4x32xf32>
    %cst_11 = arith.constant dense<0.000000e+00> : vector<1x32xf32>
    %11 = tpu.matmul %9, %10, %cst_11 {dimension_numbers = #tpu.dot_dimension_numbers<[1], [0], [0], [1], [0, 0, 1, 1], [], []>} : vector<1x4xf32>, vector<4x32xf32>, vector<1x32xf32> -> vector<1x32xf32>
    %c0_12 = arith.constant 0 : index
    %c0_13 = arith.constant 0 : index
    %12 = vector.load %arg5[%c0_12, %c0_13] : memref<1x32xf32, #tpu.memory_space<vmem>>, vector<1x32xf32>
    %13 = arith.addf %11, %12 : vector<1x32xf32>
    %14 = arith.negf %13 : vector<1x32xf32>
    %15 = math.exp %14 : vector<1x32xf32>
    %cst_14 = arith.constant 1.000000e+00 : f32
    %16 = vector.broadcast %cst_14 : f32 to vector<1x32xf32>
    %17 = arith.addf %16, %15 : vector<1x32xf32>
    %18 = arith.divf %16, %17 : vector<1x32xf32>
    %19 = vector.shape_cast %18 : vector<1x32xf32> to vector<1x32x1xf32>
    %20 = vector.broadcast %19 : vector<1x32x1xf32> to vector<1x32x128xf32>
    %21 = arith.mulf %0, %20 : vector<1x32x128xf32>
    %c0_15 = arith.constant 0 : index
    %c0_16 = arith.constant 0 : index
    %c0_17 = arith.constant 0 : index
    %22 = vector.load %arg6[%c0_15, %c0_16, %c0_17] : memref<1x32x128xf32, #tpu.memory_space<vmem>>, vector<1x32x128xf32>
    tpu.vector_store %arg6[%c0_15, %c0_16, %c0_17], %21 {strides = array<i32>} : memref<1x32x128xf32, #tpu.memory_space<vmem>>, vector<1x32x128xf32>,
    return
  }
  func.func @transform_0(%arg0: i32) -> (i32, i32, i32) {
    %c0_i32 = arith.constant 0 : i32
    %c0_i32_0 = arith.constant 0 : i32
    %c0_i32_1 = arith.constant 0 : i32
    return %arg0, %c0_i32, %c0_i32_0 : i32, i32, i32
  }
  func.func @transform_1(%arg0: i32) -> (i32, i32) {
    %c0_i32 = arith.constant 0 : i32
    %c0_i32_0 = arith.constant 0 : i32
    %c0_i32_1 = arith.constant 0 : i32
    return %c0_i32, %c0_i32_0 : i32, i32
  }
  func.func @transform_2(%arg0: i32) -> (i32, i32) {
    %c0_i32 = arith.constant 0 : i32
    %c0_i32_0 = arith.constant 0 : i32
    %c0_i32_1 = arith.constant 0 : i32
    return %c0_i32, %c0_i32_0 : i32, i32
  }
  func.func @transform_3(%arg0: i32) -> (i32, i32) {
    %c0_i32 = arith.constant 0 : i32
    %c0_i32_0 = arith.constant 0 : i32
    %c0_i32_1 = arith.constant 0 : i32
    return %c0_i32, %c0_i32_0 : i32, i32
  }
  func.func @transform_4(%arg0: i32) -> (i32, i32) {
    %c0_i32 = arith.constant 0 : i32
    %c0_i32_0 = arith.constant 0 : i32
    %c0_i32_1 = arith.constant 0 : i32
    return %c0_i32, %c0_i32_0 : i32, i32
  }
  func.func @transform_5(%arg0: i32) -> (i32, i32, i32) {
    %c0_i32 = arith.constant 0 : i32
    %c0_i32_0 = arith.constant 0 : i32
    %c0_i32_1 = arith.constant 0 : i32
    return %arg0, %c0_i32, %c0_i32_0 : i32, i32, i32
  }
}

</mosaic_0001>

<bundles_post_ra>
// kernel: attention_layer.1
= control target key start
LH: loop header
LB: loop body
LE: loop exit
PB: predicated region body
PF: predicated region fallthrough
CT: control target
= control target key end

     0   :  { %s613_s18 = smov 0   ;;  %s674_s0 = inlined_call_operand.vmem [shape: f32[2,32,128], index: 0, kind: input, shape index: {}, may-alias: {0,5}]   ;;  %s675_s1 = inlined_call_operand.vmem [shape: f32[32,4], index: 1, kind: input, shape index: {}]   ;;  %s676_s2 = inlined_call_operand.vmem [shape: f32[1,4], index: 2, kind: input, shape index: {}]   ;;  %s677_s3 = inlined_call_operand.vmem [shape: f32[4,32], index: 3, kind: input, shape index: {}]   ;;  %s678_s4 = inlined_call_operand.vmem [shape: f32[1,32], index: 4, kind: input, shape index: {}]   ;;  %s679_s5 = inlined_call_operand.vmem [shape: f32[2,32,128], index: 5, kind: output, shape index: {}, may-alias: {0,5}]  }
   0x1 LB: > { %s519_s19 = sadd.s32 4294967295, %s579_s18   ;;  %p523_p0 = scmp.ge.s32.totalorder %s579_s18, 1  ;;  %s579_s18 = sphi %s613_s18, %s15_s18  }
   0x2   : > { %p187_p1 = scmp.lt.s32.totalorder %s579_s18, 3 }
   0x4   : > { %p188_p2 = pnand %p523_p0, %p187_p1 }
   0x5   : > { %p215_p3 = scmp.lt.s32.totalorder (!%p188_p2), %s519_s19, 1 }
   0x6   : > { %191 = sbr.rel (%p188_p2) target bundleno = 716 (0x2cc), region = 40 }
   0xb   : > { %s681_s19 = smov (!%p215_p3, %s519_s19), 1  ;;  %v581_v4 = vmov 0.0   ;;  %v244_v5 = vld [vmem:[%s675_s1 + $0x18] sm:$0xff]  ;;  %v243_v6 = vld [vmem:[%s675_s1 + $0x10] sm:$0xff]  ;;  %v242_v7 = vld [vmem:[%s675_s1 + $0x8] sm:$0xff]  ;;  %vm582_vm0 = vmmov 0   ;;  %v250_v9 = vlaneseq }
   0xc   : > { %s534_s20 = sshll.u32 %s681_s19, 5  ;;  %543 = vmatprep.subr.mxu0 %v581_v4  ;;  %554 = vmatprep.subr.mxu1 %v581_v4  ;;  %v241_v8 = vld [vmem:[%s675_s1] sm:$0xff]  ;;  %vm261_vm1 = vcmask 130112   ;;  %vm268_vm2 = vcmask 195712   ;;  %vm275_vm3 = vcmask 261312   ;;  %vm277_vm4 = vcmask 261120  }
   0xd   : > { %s219_s23 = scalar_lea.vmem %s674_s0, %s534_s20  ;;  %544 = vmatpush3.msra.mxu0 %v244_v5  ;;  %551 = vmatprep.mubr.msk.f32.mxu0 %vm582_vm0, %v581_v4  ;;  %v251_v10 = vand.u32 127, %v250_v9  ;;  %v253_v11 = vshrl.u32 %v250_v9, 7  ;;  %v351_v34 = vld [vmem:[%s677_s3] sm:$0xf]  ;;  %vm357_vm5 = vcmask 1043456   ;;  %vm353_vm6 = vcmask 31744   ;;  %s224_s15 = scalar_lea.vmem %s679_s5, %s534_s20 }
   0xe   : > { %v629_v0 = vld [vmem:[%s219_s23] sm:$0xff]  ;;  %v631_v1 = vld [vmem:[%s219_s23 + $0x10] sm:$0xff]  ;;  %v635_v2 = vld [vmem:[%s219_s23 + $0x8] sm:$0xff]  ;;  %545 = vmatprep.subr.mxu0 %v581_v4  ;;  %556 = vmatprep.mubr.msk.f32.mxu1 %vm582_vm0, %v581_v4 }
   0xf   : > { %229 = vadd.xlane.f32.xlu0 %v629_v0  ;;  %233 = vadd.xlane.f32.xlu1 %v631_v1  ;;  %v637_v3 = vld [vmem:[%s219_s23 + $0x18] sm:$0xff]  ;;  %v256_v12 = vadd.s32 4294967288, %v251_v10  ;;  %v270_v13 = vadd.s32 4294967272, %v251_v10  ;;  %v263_v15 = vadd.s32 4294967280, %v251_v10  ;;  %v254_v17 = vsub.s32 %v251_v10, %v253_v11  ;;  %v245_v35 = vld [vmem:[%s676_s2] sm:$0x1] }
  0x10   : > { %546 = vmatpush3.msra.mxu0 %v243_v6  ;;  %555 = vmatpush3.msk.msra.mxu1 %vm357_vm5, %v351_v34  ;;  %v352_v40 = vld [vmem:[%s678_s4] sm:$0x1]  ;;  %v439_v47 = vsub.s32 0, %v253_v11 }
  0x11   : > { %547 = vmatprep.subr.mxu0 %v581_v4  ;;  %v259_v19 = vsub.s32 %v256_v12, %v253_v11  ;;  %v273_v20 = vsub.s32 %v270_v13, %v253_v11  ;;  %v266_v21 = vsub.s32 %v263_v15, %v253_v11 }
  0x12   : > { %548 = vmatpush3.msra.mxu0 %v242_v7 }
  0x13   : > { %231 = vadd.xlane.f32.xlu0 %v635_v2  ;;  %235 = vadd.xlane.f32.xlu1 %v637_v3 }
  0x14   : > { %549 = vmatprep.subr.mxu0 %v581_v4 }
  0x15   : > { %550 = vmatpush3.msra.mxu0 %v241_v8 }
  0x98   : > { %v230_v14 = vpop.xlane.xlu0 %229  ;;  %v234_v16 = vpop.xlane.xlu1 %233 }
  0x99   : > { %v237_v18 = vmul.f32 0.0625, %v230_v14  ;;  %v239_v22 = vmul.f32 0.0625, %v234_v16 }
  0x9b   : > { %v255_v27 = vrot.slane %v237_v18, %v254_v17  ;;  %v267_v30 = vrot.slane %v239_v22, %v266_v21 }
  0x9c   : > { %v232_v23 = vpop.xlane.xlu0 %231  ;;  %v236_v24 = vpop.xlane.xlu1 %235 }
  0x9d   : > { %v238_v25 = vmul.f32 0.0625, %v232_v23  ;;  %v240_v26 = vmul.f32 0.0625, %v236_v24 }
  0x9f   : > { %v260_v28 = vrot.slane %v238_v25, %v259_v19  ;;  %v274_v29 = vrot.slane %v240_v26, %v273_v20 }
  0xa1   : > { %v262_v31 = vsel %vm261_vm1, %v260_v28, %v255_v27 }
  0xa2   : > { %v269_v32 = vsel %vm268_vm2, %v267_v30, %v262_v31 }
  0xa3   : > { %v276_v33 = vsel %vm275_vm3, %v274_v29, %v269_v32 }
  0xa4   : > { %552 = vmatmul.mubr.msk.f32.vlgmr.msra.gmra.mxu0 %vm277_vm4, %v276_v33 }
 0x164   : > { %v346_v36 = vpop.f32.mrf.mxu0 }
 0x165   : > { %v347_v37 = vadd.f32 %v346_v36, %v245_v35 }
 0x166   : > { %v553_v38 = vpop.f32.mrf.mxu0 }
 0x167   : > { %v350_v39 = vmax.f32 %v347_v37, 0.0 }
 0x169   : > { %557 = vmatmul.mubr.msk.f32.vlgmr.msra.gmra.mxu1 %vm353_vm6, %v350_v39 }
 0x229   : > { %v427_v41 = vpop.f32.mrf.mxu1 }
 0x22a   : > { %v428_v42 = vadd.f32 %v427_v41, %v352_v40 }
 0x22b   : > { %v558_v43 = vpop.f32.mrf.mxu1 }
 0x22c   : > { %v531_v44 = vmul.f32 -1.442695, %v428_v42 }
 0x22e   : > { %569 = vpow2.f32 %v531_v44 }
 0x23b   : > { %v570_v45 = vpop.eup %569 }
 0x23c   : > { %v434_v46 = vadd.f32 1.0, %v570_v45 }
 0x23e   : > { %571 = vrcp.f32 %v434_v46 }
 0x24b   : > { %v572_v48 = vpop.eup %571 }
 0x24c   : > { %v440_v49 = vrot.slane %v572_v48, %v439_v47 }
 0x24e   : > { %446 = vbcast.lane.b32.xlu1 %v440_v49, 264  ;;  %442 = vbcast.lane.b32.xlu0 %v440_v49, 256 }
 0x252   : > { %450 = vbcast.lane.b32.xlu1 %v440_v49, 272 }
 0x256   : > { %454 = vbcast.lane.b32.xlu1 %v440_v49, 280 }
 0x2c0   : > { %v447_v50 = vpop.permute.xlu1 %446  ;;  %v443_v51 = vpop.permute.xlu0 %442 }
 0x2c1   : > { %v457_v52 = vmul.f32 %v447_v50, %v635_v2  ;;  %v456_v53 = vmul.f32 %v443_v51, %v629_v0 }
 0x2c3   : > { %461 = vst [vmem:[%s224_s15 + $0x8] sm:$0xff] %v457_v52  ;;  %460 = vst [vmem:[%s224_s15] sm:$0xff] %v456_v53 }
 0x2c4   : > { %v451_v54 = vpop.permute.xlu1 %450 }
 0x2c5   : > { %v458_v55 = vmul.f32 %v451_v54, %v631_v1 }
 0x2c7   : > { %462 = vst [vmem:[%s224_s15 + $0x10] sm:$0xff] %v458_v55 }
 0x2c8   : > { %v455_v56 = vpop.permute.xlu1 %454 }
 0x2c9   : > { %v459_v57 = vmul.f32 %v455_v56, %v637_v3 }
 0x2cb   : > { %463 = vst [vmem:[%s224_s15 + $0x18] sm:$0xff] %v459_v57 }
 0x2cc PF: > { %s15_s18 = sadd.s32 1, %s579_s18  }
 0x2cd   : > { %p12_p4 = scmp.ge.s32.totalorder %s15_s18, 4  }
 0x2cf   :  { %14 = sbr.rel (!%p12_p4) target bundleno = 1 (0x1), region = 70 }

</bundles_post_ra>
